<compile_context>
chip_gen: v5e
topology: v5e:2x2
jax: 0.10.0
libtpu: 0.0.40
codegen_flags: <defaults>
</compile_context>

<pallas_src>
import functools

import jax
import jax.numpy as jnp
from jax.experimental import pallas as pl
from jax.experimental.pallas import tpu as pltpu


# ----------------------------------------------------------------------------- helpers
def _round_up(x, m):
    return ((x + m - 1) // m) * m


def _sublane_pack(dtype):
    # Row-block granularity: 8 sublanes x (4 / itemsize) packing.
    return 8 * max(1, 4 // jnp.dtype(dtype).itemsize)


def _vmem_capacity_bytes():
    try:
        return int(pltpu.get_tpu_info().vmem_capacity_bytes)
    except Exception:
        return 64 * 1024 * 1024  # conservative (v7x per-TensorCore VMEM)


def _vmem_budget_and_limit():
    cap = _vmem_capacity_bytes()
    # ~96 MiB resident budget on 128 MiB parts (v5e/v6e), ~48 MiB on 64 MiB (v7x).
    budget = max(16 << 20, min(int(0.75 * cap), cap - (16 << 20)))
    limit = min(cap, budget + (16 << 20))
    return budget, limit


# ----------------------------------------------------------------------------- fused chain kernel
def _make_chain_kernel(n_ops):
    def kernel(x_ref, *refs):
        w_refs = refs[:n_ops]
        o_ref = refs[n_ops]
        h = x_ref[...]
        for idx in range(n_ops):
            h = jnp.dot(h, w_refs[idx][...], preferred_element_type=jnp.float32)
            if idx < n_ops - 1 and w_refs[idx].dtype != jnp.float32:
                # Keep intermediates in the (bf16) compute dtype for MXU-native feeds.
                h = h.astype(w_refs[idx].dtype)
        o_ref[...] = h.astype(o_ref.dtype)

    return kernel


def _fused_footprint(rows_tile, dims, itemsize, w_bufs):
    w_bytes = sum(dims[i] * dims[i + 1] for i in range(len(dims) - 1)) * itemsize * w_bufs
    io_bytes = 2 * rows_tile * (dims[0] + dims[-1]) * itemsize  # double-buffered x / out
    srt = sorted(dims, reverse=True)
    inter_bytes = rows_tile * (srt[0] + (srt[1] if len(srt) > 1 else 0)) * 4  # f32 temporaries
    return w_bytes + io_bytes + inter_bytes


def _fused_chain_call(x_p, ws, out_dtype, tm, single_buffer_w, vmem_limit):
    rows_p, k0 = x_p.shape
    n_ops = len(ws)
    out_dim = int(ws[-1].shape[1])

    w_kwargs = {}
    if single_buffer_w and hasattr(pl, "Buffered"):
        # W block index never changes across the grid -> single-buffer it.
        w_kwargs = {"pipeline_mode": pl.Buffered(1)}

    in_specs = [pl.BlockSpec((tm, k0), lambda i: (i, 0))]
    for w in ws:
        in_specs.append(pl.BlockSpec(tuple(int(d) for d in w.shape),
                                     lambda i: (0, 0), **w_kwargs))

    return pl.pallas_call(
        _make_chain_kernel(n_ops),
        out_shape=jax.ShapeDtypeStruct((rows_p, out_dim), out_dtype),
        grid_spec=pltpu.PrefetchScalarGridSpec(
            num_scalar_prefetch=0,
            grid=(rows_p // tm,),
            in_specs=in_specs,
            out_specs=pl.BlockSpec((tm, out_dim), lambda i: (i, 0)),
        ),
        compiler_params=pltpu.CompilerParams(
            dimension_semantics=("parallel",),
            vmem_limit_bytes=int(vmem_limit),
        ),
    )(x_p, *ws)


# ----------------------------------------------------------------------------- streaming fallback
def _mm_kernel_single(x_ref, w_ref, o_ref):
    o_ref[...] = jnp.dot(x_ref[...], w_ref[...],
                         preferred_element_type=jnp.float32).astype(o_ref.dtype)


def _mm_kernel_f32(x_ref, w_ref, o_ref):
    @pl.when(pl.program_id(2) == 0)
    def _():
        o_ref[...] = jnp.zeros_like(o_ref)

    o_ref[...] += jnp.dot(x_ref[...], w_ref[...], preferred_element_type=jnp.float32)


def _mm_kernel_acc(x_ref, w_ref, o_ref, acc_ref):
    k = pl.program_id(2)

    @pl.when(k == 0)
    def _():
        acc_ref[...] = jnp.zeros_like(acc_ref)

    acc_ref[...] += jnp.dot(x_ref[...], w_ref[...], preferred_element_type=jnp.float32)

    @pl.when(k == pl.num_programs(2) - 1)
    def _():
        o_ref[...] = acc_ref[...].astype(o_ref.dtype)


def _streaming_matmul(x2d, w, *, budget, vmem_limit, tm=512, tk=1024, tn=1024):
    """Tiled x2d @ w for operator matrices too large to keep resident in VMEM."""
    rows, K = x2d.shape
    _, N = w.shape
    dtype = x2d.dtype
    itemsize = jnp.dtype(dtype).itemsize
    pack = _sublane_pack(dtype)

    tm = min(tm, _round_up(rows, pack))
    tk = min(tk, _round_up(K, 256))   # 256-aligned panels for the 2x256^2 MXUs
    tn = min(tn, _round_up(N, 256))

    def footprint(tm_, tk_, tn_):
        f = 2 * (tm_ * tk_ + tk_ * tn_ + tm_ * tn_) * itemsize
        if dtype != jnp.float32:
            f += tm_ * tn_ * 4  # f32 scratch accumulator
        return f

    while footprint(tm, tk, tn) > budget:
        if tk >= tn and tk > 256:
            tk //= 2
        elif tn > 256:
            tn //= 2
        elif tm > pack:
            tm = max(pack, tm // 2)
        else:
            break

    rows_p, k_p, n_p = _round_up(rows, tm), _round_up(K, tk), _round_up(N, tn)

    x_p = x2d
    if (rows_p, k_p) != (rows, K):
        x_p = jnp.pad(x2d, ((0, rows_p - rows), (0, k_p - K)))
    w_p = w
    if (k_p, n_p) != (K, N):
        w_p = jnp.pad(w, ((0, k_p - K), (0, n_p - N)))

    grid = (rows_p // tm, n_p // tn, k_p // tk)

    if grid[2] == 1:
        kernel, scratch = _mm_kernel_single, []
    elif dtype == jnp.float32:
        kernel, scratch = _mm_kernel_f32, []
    else:
        kernel, scratch = _mm_kernel_acc, [pltpu.VMEM((tm, tn), jnp.float32)]

    out = pl.pallas_call(
        kernel,
        out_shape=jax.ShapeDtypeStruct((rows_p, n_p), dtype),
        grid_spec=pltpu.PrefetchScalarGridSpec(
            num_scalar_prefetch=0,
            grid=grid,
            in_specs=[
                pl.BlockSpec((tm, tk), lambda i, j, k: (i, k)),
                pl.BlockSpec((tk, tn), lambda i, j, k: (k, j)),
            ],
            out_specs=pl.BlockSpec((tm, tn), lambda i, j, k: (i, j)),
            scratch_shapes=scratch,
        ),
        compiler_params=pltpu.CompilerParams(
            dimension_semantics=("parallel", "parallel", "arbitrary"),
            vmem_limit_bytes=int(vmem_limit),
        ),
    )(x_p, w_p)

    if (rows_p, n_p) != (rows, N):
        out = out[:rows, :N]
    return out


# ----------------------------------------------------------------------------- fused forward
def _composite_dense_forward_impl(x2d, ws, out_dtype, single_buffer_w):
    rows, k0 = x2d.shape
    dtype = x2d.dtype
    itemsize = jnp.dtype(dtype).itemsize
    pack = _sublane_pack(dtype)
    budget, vmem_limit = _vmem_budget_and_limit()

    dims = [int(k0)] + [int(w.shape[1]) for w in ws]

    tm = min(256, _round_up(rows, pack))
    rows_p = _round_up(rows, tm)
    # Keep >=2 programs on the 'parallel' rows axis when legal (v7x has 2 TCs/chip).
    while rows_p // tm < 2 and tm % (2 * pack) == 0:
        tm //= 2

    w_bufs = 1 if single_buffer_w else 2
    if _fused_footprint(tm, dims, itemsize, w_bufs) <= budget:
        x_p = x2d if rows_p == rows else jnp.pad(x2d, ((0, rows_p - rows), (0, 0)))
        out = _fused_chain_call(x_p, ws, out_dtype, tm, single_buffer_w, vmem_limit)
        return out if rows_p == rows else out[:rows]

    # Fallback: per-operator streaming matmuls (intermediates round-trip HBM).
    h = x2d
    for w in ws:
        h = _streaming_matmul(h, w, budget=budget, vmem_limit=vmem_limit)
    return h.astype(out_dtype)


@functools.partial(jax.jit, static_argnames=("out_dtype", "single_buffer_w"))
def _composite_dense_forward_jit(x2d, ws, out_dtype, single_buffer_w):
    return _composite_dense_forward_impl(x2d, ws, out_dtype, single_buffer_w)


def composite_dense_forward(x2d, ws, out_dtype):
    ws = tuple(ws)
    try:
        return _composite_dense_forward_jit(x2d, ws, out_dtype=out_dtype,
                                            single_buffer_w=True)
    except Exception:
        # pipeline_mode=pl.Buffered(1) unavailable/rejected: use default buffering.
        return _composite_dense_forward_jit(x2d, ws, out_dtype=out_dtype,
                                            single_buffer_w=False)


# ----------------------------------------------------------------------------- operator classes
class DenseMatrixOperator:
    """Concrete dense MatrixOperator: forward(x) = x @ A^T over the last axis.

    A: [out_dim, in_dim];  x: [B, C, in_dim] -> [B, C, out_dim].
    Optionally pass compute_dtype=jnp.bfloat16 for MXU-native compute (f32 accumulate).
    """

    def __init__(self, A, compute_dtype=None):
        A = jnp.asarray(A)
        if compute_dtype is not None:
            A = A.astype(compute_dtype)
        self.A = A
        self.W = A.T  # [in_dim, out_dim], transposed once at construction
        self.input_shape = (int(A.shape[1]),)
        self.output_shape = (int(A.shape[0]),)

    def forward(self, x):
        B, C, K = x.shape
        assert K == self.input_shape[0]
        out2d = composite_dense_forward(
            x.reshape(B * C, K).astype(self.W.dtype), (self.W,), out_dtype=x.dtype)
        return out2d.reshape(B, C, self.output_shape[0])


class CompositeMatrixOperator:
    """Matrix-matrix product of multiple linear operators (applied in list order)."""

    def __init__(self, matrix_operators):
        assert isinstance(matrix_operators, list) and len(matrix_operators) > 0
        self.matrix_operators = matrix_operators
        self.input_shape = matrix_operators[0].input_shape
        self.output_shape = matrix_operators[-1].output_shape
        # When every sub-operator is dense, fuse the whole chain into ONE kernel:
        # the row panel stays in VMEM and every W_i is applied back-to-back.
        self._dense_chain = None
        if all(isinstance(op, DenseMatrixOperator) for op in matrix_operators):
            self._dense_chain = tuple(op.W for op in matrix_operators)

    def forward(self, x):
        if self._dense_chain is not None:
            B, C, K = x.shape
            assert K == self.input_shape[0]
            cd = self._dense_chain[0].dtype
            out2d = composite_dense_forward(
                x.reshape(B * C, K).astype(cd), self._dense_chain, out_dtype=x.dtype)
            return out2d.reshape(B, C, self.output_shape[0])
        # TODO(synk): non-dense sub-operators fall back to sequential per-op forward.
        result = x
        for matrix_operator in self.matrix_operators:
            result = matrix_operator.forward(result)
        return result


# ----------------------------------------------------------------------------- demo / check
if __name__ == "__main__":
    key = jax.random.PRNGKey(0)
    k1, k2, k3, kx = jax.random.split(key, 4)

    # Small, non-128-aligned chain to exercise full-dim blocks: 32 -> 48 -> 64 -> 16.
    B, C = 2, 4
    A1 = jax.random.normal(k1, (48, 32), dtype=jnp.float32)
    A2 = jax.random.normal(k2, (64, 48), dtype=jnp.float32)
    A3 = jax.random.normal(k3, (16, 64), dtype=jnp.float32)
    x = jax.random.normal(kx, (B, C, 32), dtype=jnp.float32)

    composite = CompositeMatrixOperator(
        [DenseMatrixOperator(A1), DenseMatrixOperator(A2), DenseMatrixOperator(A3)]
    )

    out = composite.forward(x)
    jax.block_until_ready(out)

    # Plain-JAX reference for the same operator chain.
    ref = x
    for A in (A1, A2, A3):
        ref = jnp.einsum("bck,nk->bcn", ref, A)

    assert out.shape == (B, C, 16)
    assert jnp.allclose(out, ref, atol=1e-3, rtol=1e-3)

    print("KERNEL_OK")
</pallas_src>

<mosaic_0001>
module attributes {stable_mosaic.version = 11 : i64} {
  func.func @kernel(%arg0: i32, %arg1: memref<8x32xf32, #tpu.memory_space<vmem>>, %arg2: memref<32x48xf32, #tpu.memory_space<vmem>>, %arg3: memref<48x64xf32, #tpu.memory_space<vmem>>, %arg4: memref<64x16xf32, #tpu.memory_space<vmem>>, %arg5: memref<8x16xf32, #tpu.memory_space<vmem>>) attributes {dimension_semantics = [#tpu.dimension_semantics<parallel>], iteration_bounds = array<i64: 1>, scalar_prefetch = 0 : i64, scratch_operands = 0 : i64, tpu.core_type = #tpu.core_type<tc>, window_params = [{transform_indices = @transform_0, window_bounds = array<i64: 8, 32>}, {pipeline_mode = #tpu.pipeline_mode<synchronous>, transform_indices = @transform_1, window_bounds = array<i64: 32, 48>}, {pipeline_mode = #tpu.pipeline_mode<synchronous>, transform_indices = @transform_2, window_bounds = array<i64: 48, 64>}, {pipeline_mode = #tpu.pipeline_mode<synchronous>, transform_indices = @transform_3, window_bounds = array<i64: 64, 16>}, {transform_indices = @transform_4, window_bounds = array<i64: 8, 16>}]} {
    %c0 = arith.constant 0 : index
    %c0_0 = arith.constant 0 : index
    %0 = vector.load %arg1[%c0, %c0_0] : memref<8x32xf32, #tpu.memory_space<vmem>>, vector<8x32xf32>
    %c0_1 = arith.constant 0 : index
    %c0_2 = arith.constant 0 : index
    %1 = vector.load %arg2[%c0_1, %c0_2] : memref<32x48xf32, #tpu.memory_space<vmem>>, vector<32x48xf32>
    %cst = arith.constant dense<0.000000e+00> : vector<8x48xf32>
    %2 = tpu.matmul %0, %1, %cst {dimension_numbers = #tpu.dot_dimension_numbers<[1], [0], [0], [1], [0, 0, 1, 1], [], []>} : vector<8x32xf32>, vector<32x48xf32>, vector<8x48xf32> -> vector<8x48xf32>
    %c0_3 = arith.constant 0 : index
    %c0_4 = arith.constant 0 : index
    %3 = vector.load %arg3[%c0_3, %c0_4] : memref<48x64xf32, #tpu.memory_space<vmem>>, vector<48x64xf32>
    %cst_5 = arith.constant dense<0.000000e+00> : vector<8x64xf32>
    %4 = tpu.matmul %2, %3, %cst_5 {dimension_numbers = #tpu.dot_dimension_numbers<[1], [0], [0], [1], [0, 0, 1, 1], [], []>} : vector<8x48xf32>, vector<48x64xf32>, vector<8x64xf32> -> vector<8x64xf32>
    %c0_6 = arith.constant 0 : index
    %c0_7 = arith.constant 0 : index
    %5 = vector.load %arg4[%c0_6, %c0_7] : memref<64x16xf32, #tpu.memory_space<vmem>>, vector<64x16xf32>
    %cst_8 = arith.constant dense<0.000000e+00> : vector<8x16xf32>
    %6 = tpu.matmul %4, %5, %cst_8 {dimension_numbers = #tpu.dot_dimension_numbers<[1], [0], [0], [1], [0, 0, 1, 1], [], []>} : vector<8x64xf32>, vector<64x16xf32>, vector<8x16xf32> -> vector<8x16xf32>
    %c0_9 = arith.constant 0 : index
    %c0_10 = arith.constant 0 : index
    %7 = vector.load %arg5[%c0_9, %c0_10] : memref<8x16xf32, #tpu.memory_space<vmem>>, vector<8x16xf32>
    tpu.vector_store %arg5[%c0_9, %c0_10], %6 {strides = array<i32>} : memref<8x16xf32, #tpu.memory_space<vmem>>, vector<8x16xf32>,
    return
  }
  func.func @transform_0(%arg0: i32) -> (i32, i32) {
    %c0_i32 = arith.constant 0 : i32
    %c0_i32_0 = arith.constant 0 : i32
    return %arg0, %c0_i32 : i32, i32
  }
  func.func @transform_1(%arg0: i32) -> (i32, i32) {
    %c0_i32 = arith.constant 0 : i32
    %c0_i32_0 = arith.constant 0 : i32
    %c0_i32_1 = arith.constant 0 : i32
    return %c0_i32, %c0_i32_0 : i32, i32
  }
  func.func @transform_2(%arg0: i32) -> (i32, i32) {
    %c0_i32 = arith.constant 0 : i32
    %c0_i32_0 = arith.constant 0 : i32
    %c0_i32_1 = arith.constant 0 : i32
    return %c0_i32, %c0_i32_0 : i32, i32
  }
  func.func @transform_3(%arg0: i32) -> (i32, i32) {
    %c0_i32 = arith.constant 0 : i32
    %c0_i32_0 = arith.constant 0 : i32
    %c0_i32_1 = arith.constant 0 : i32
    return %c0_i32, %c0_i32_0 : i32, i32
  }
  func.func @transform_4(%arg0: i32) -> (i32, i32) {
    %c0_i32 = arith.constant 0 : i32
    %c0_i32_0 = arith.constant 0 : i32
    return %arg0, %c0_i32 : i32, i32
  }
}

module attributes {stable_mosaic.version = 11 : i64} {
  func.func @kernel(%arg0: i32, %arg1: memref<8x32xf32, #tpu.memory_space<vmem>>, %arg2: memref<32x48xf32, #tpu.memory_space<vmem>>, %arg3: memref<48x64xf32, #tpu.memory_space<vmem>>, %arg4: memref<64x16xf32, #tpu.memory_space<vmem>>, %arg5: memref<8x16xf32, #tpu.memory_space<vmem>>) attributes {dimension_semantics = [#tpu.dimension_semantics<parallel>], iteration_bounds = array<i64: 1>, scalar_prefetch = 0 : i64, scratch_operands = 0 : i64, tpu.core_type = #tpu.core_type<tc>, window_params = [{transform_indices = @transform_0, window_bounds = array<i64: 8, 32>}, {pipeline_mode = #tpu.pipeline_mode<synchronous>, transform_indices = @transform_1, window_bounds = array<i64: 32, 48>}, {pipeline_mode = #tpu.pipeline_mode<synchronous>, transform_indices = @transform_2, window_bounds = array<i64: 48, 64>}, {pipeline_mode = #tpu.pipeline_mode<synchronous>, transform_indices = @transform_3, window_bounds = array<i64: 64, 16>}, {transform_indices = @transform_4, window_bounds = array<i64: 8, 16>}]} {
    %c0 = arith.constant 0 : index
    %c0_0 = arith.constant 0 : index
    %0 = vector.load %arg1[%c0, %c0_0] : memref<8x32xf32, #tpu.memory_space<vmem>>, vector<8x32xf32>
    %c0_1 = arith.constant 0 : index
    %c0_2 = arith.constant 0 : index
    %1 = vector.load %arg2[%c0_1, %c0_2] : memref<32x48xf32, #tpu.memory_space<vmem>>, vector<32x48xf32>
    %cst = arith.constant dense<0.000000e+00> : vector<8x48xf32>
    %2 = tpu.matmul %0, %1, %cst {dimension_numbers = #tpu.dot_dimension_numbers<[1], [0], [0], [1], [0, 0, 1, 1], [], []>} : vector<8x32xf32>, vector<32x48xf32>, vector<8x48xf32> -> vector<8x48xf32>
    %c0_3 = arith.constant 0 : index
    %c0_4 = arith.constant 0 : index
    %3 = vector.load %arg3[%c0_3, %c0_4] : memref<48x64xf32, #tpu.memory_space<vmem>>, vector<48x64xf32>
    %cst_5 = arith.constant dense<0.000000e+00> : vector<8x64xf32>
    %4 = tpu.matmul %2, %3, %cst_5 {dimension_numbers = #tpu.dot_dimension_numbers<[1], [0], [0], [1], [0, 0, 1, 1], [], []>} : vector<8x48xf32>, vector<48x64xf32>, vector<8x64xf32> -> vector<8x64xf32>
    %c0_6 = arith.constant 0 : index
    %c0_7 = arith.constant 0 : index
    %5 = vector.load %arg4[%c0_6, %c0_7] : memref<64x16xf32, #tpu.memory_space<vmem>>, vector<64x16xf32>
    %cst_8 = arith.constant dense<0.000000e+00> : vector<8x16xf32>
    %6 = tpu.matmul %4, %5, %cst_8 {dimension_numbers = #tpu.dot_dimension_numbers<[1], [0], [0], [1], [0, 0, 1, 1], [], []>} : vector<8x64xf32>, vector<64x16xf32>, vector<8x16xf32> -> vector<8x16xf32>
    %c0_9 = arith.constant 0 : index
    %c0_10 = arith.constant 0 : index
    %7 = vector.load %arg5[%c0_9, %c0_10] : memref<8x16xf32, #tpu.memory_space<vmem>>, vector<8x16xf32>
    tpu.vector_store %arg5[%c0_9, %c0_10], %6 {strides = array<i32>} : memref<8x16xf32, #tpu.memory_space<vmem>>, vector<8x16xf32>,
    return
  }
  func.func @transform_0(%arg0: i32) -> (i32, i32) {
    %c0_i32 = arith.constant 0 : i32
    %c0_i32_0 = arith.constant 0 : i32
    return %arg0, %c0_i32 : i32, i32
  }
  func.func @transform_1(%arg0: i32) -> (i32, i32) {
    %c0_i32 = arith.constant 0 : i32
    %c0_i32_0 = arith.constant 0 : i32
    %c0_i32_1 = arith.constant 0 : i32
    return %c0_i32, %c0_i32_0 : i32, i32
  }
  func.func @transform_2(%arg0: i32) -> (i32, i32) {
    %c0_i32 = arith.constant 0 : i32
    %c0_i32_0 = arith.constant 0 : i32
    %c0_i32_1 = arith.constant 0 : i32
    return %c0_i32, %c0_i32_0 : i32, i32
  }
  func.func @transform_3(%arg0: i32) -> (i32, i32) {
    %c0_i32 = arith.constant 0 : i32
    %c0_i32_0 = arith.constant 0 : i32
    %c0_i32_1 = arith.constant 0 : i32
    return %c0_i32, %c0_i32_0 : i32, i32
  }
  func.func @transform_4(%arg0: i32) -> (i32, i32) {
    %c0_i32 = arith.constant 0 : i32
    %c0_i32_0 = arith.constant 0 : i32
    return %arg0, %c0_i32 : i32, i32
  }
}

</mosaic_0001>

<bundles_post_ra>
// kernel: _composite_dense_forward_jit.1
= control target key start
LH: loop header
LB: loop body
LE: loop exit
PB: predicated region body
PF: predicated region fallthrough
CT: control target
= control target key end

     0   :  { %9 = vsyncpa [#allocation3], 0  ;;  %s286_s0 = inlined_call_operand.hbm [shape: f32[8,32], index: 0, kind: input, shape index: {}]   ;;  %s287_s1 = inlined_call_operand.vmem [shape: f32[32,48], index: 1, kind: input, shape index: {}]   ;;  %s288_s2 = inlined_call_operand.vmem [shape: f32[48,64], index: 2, kind: input, shape index: {}]   ;;  %s289_s3 = inlined_call_operand.vmem [shape: f32[64,16], index: 3, kind: input, shape index: {}]   ;;  %s290_s4 = inlined_call_operand.hbm [shape: f32[8,16], index: 4, kind: output, shape index: {}]  }
   0x1   :  { %10 = vsyncpa [#allocation4], 0  ;;  %s16_s17 = sshll.u32 %s286_s0, 4  ;;  %s199_s18 = smov [#allocation2]   ;;  %s17_s17 = int_to_ptr.hbm [resolvable:$true] %s16_s17 }
   0x2   :  { %s18_s19 = sshll.u32 %s199_s18, 4  ;;  %s19_s19 = int_to_ptr.vmem [resolvable:$true] %s18_s19 }
   0x3   :  { %21 = dma.hbm_to_vmem [thread:$0]  %s17_s17, 128, %s19_s19, [#allocation3]  }
   0x4   :  { %195 = dma.done.wait [#allocation3], 128  }
   0x5   :  { %196 = vsyncadd [#allocation3], 4294967168  ;;  %v36_v0 = vld [vmem:[%s287_s1 + $0x18] sm:$0xff]  ;;  %v35_v1 = vld [vmem:[%s287_s1 + $0x10] sm:$0xff]  ;;  %vm37_vm0 = vcmask 261120   ;;  %vm67_vm1 = vcmask 392192  }
   0x6   :  { %53 = vmatpush.msra.mxu0 %v36_v0  ;;  %v66_v2 = vld [vmem:[%s288_s2 + $0x28] sm:$0xff]  ;;  %v65_v4 = vld [vmem:[%s288_s2 + $0x20] sm:$0xff]  ;;  %v64_v5 = vld [vmem:[%s288_s2 + $0x18] sm:$0xff]  ;;  %vm99_vm2 = vcmask 523264   ;;  %s200_s26 = smov [#allocation5]   ;;  %s132_s30 = sshll.u32 %s290_s4, 4  ;;  %s133_s30 = int_to_ptr.hbm [resolvable:$true] %s132_s30 }
   0x7   :  { %v34_v3 = vld [vmem:[%s287_s1 + $0x8] sm:$0xff]  ;;  %81 = vmatpush.msra.mxu1 %v66_v2  ;;  %v33_v6 = vld [vmem:[%s287_s1] sm:$0xff]  ;;  %v63_v8 = vld [vmem:[%s288_s2 + $0x10] sm:$0xff]  ;;  %s130_s27 = sshll.u32 %s200_s26, 4  ;;  %vm123_vm3 = vcmask 130048   ;;  %s131_s27 = int_to_ptr.vmem [resolvable:$true] %s130_s27 }
   0x8   :  { %54 = vmatpush.msra.mxu0 %v35_v1  ;;  %v32_v7 = vld [vmem:[#allocation2] sm:$0xff]  ;;  %v62_v9 = vld [vmem:[%s288_s2 + $0x8] sm:$0xff]  ;;  %v98_v11 = vld [vmem:[%s289_s3 + $0x38] sm:$0xff] }
   0x9   :  { %82 = vmatpush.msra.mxu1 %v65_v4  ;;  %v61_v10 = vld [vmem:[%s288_s2] sm:$0xff]  ;;  %v97_v12 = vld [vmem:[%s289_s3 + $0x30] sm:$0xff]  ;;  %111 = vmatpush.msra.mxu2 %v98_v11  ;;  %v96_v13 = vld [vmem:[%s289_s3 + $0x28] sm:$0xff] }
   0xa   :  { %55 = vmatpush.msra.mxu0 %v34_v3  ;;  %v95_v14 = vld [vmem:[%s289_s3 + $0x20] sm:$0xff]  ;;  %v94_v15 = vld [vmem:[%s289_s3 + $0x18] sm:$0xff]  ;;  %v93_v16 = vld [vmem:[%s289_s3 + $0x10] sm:$0xff] }
   0xb   :  { %83 = vmatpush.msra.mxu1 %v64_v5  ;;  %112 = vmatpush.msra.mxu2 %v97_v12  ;;  %v92_v17 = vld [vmem:[%s289_s3 + $0x8] sm:$0xff]  ;;  %v91_v19 = vld [vmem:[%s289_s3] sm:$0xff] }
   0xc   :  { %56 = vmatpush.msra.mxu0 %v33_v6 }
   0xd   :  { %142 = vmatmul.msk.f32.vlgmr.msra.gmra.mxu0 %vm37_vm0, %v32_v7  ;;  %84 = vmatpush.msra.mxu1 %v63_v8 }
   0xe   :  { %113 = vmatpush.msra.mxu2 %v96_v13 }
   0xf   :  { %85 = vmatpush.msra.mxu1 %v62_v9 }
  0x10   :  { %114 = vmatpush.msra.mxu2 %v95_v14 }
  0x11   :  { %86 = vmatpush.msra.mxu1 %v61_v10 }
  0x12   :  { %115 = vmatpush.msra.mxu2 %v94_v15 }
  0x14   :  { %116 = vmatpush.msra.mxu2 %v93_v16 }
  0x16   :  { %117 = vmatpush.msra.mxu2 %v92_v17 }
  0x18   :  { %118 = vmatpush.msra.mxu2 %v91_v19 }
  0x8a   :  { %v58_v18 = vpop.f32.mrf.mxu0 }
  0x8b   :  { %143 = vmatmul.msk.f32.vlgmr.msra.gmra.mxu1 %vm67_vm1, %v58_v18 }
 0x108   :  { %v88_v20 = vpop.f32.mrf.mxu1 }
 0x109   :  { %144 = vmatmul.msk.f32.vlgmr.msra.gmra.mxu2 %vm99_vm2, %v88_v20 }
 0x18c   :  { %v120_v21 = vpop.f32.mrf.mxu2 }
 0x18d   :  { %124 = vst.msk [vmem:[#allocation5] sm:$0xff] %vm123_vm3, %v120_v21 }
 0x18e   :  { %135 = dma.vmem_to_hbm [thread:$0]  %s131_s27, 128, %s133_s30, [#allocation4]  }
 0x18f   :  { %197 = dma.done.wait [#allocation4], 128  }
 0x190   :  { %198 = vsyncadd [#allocation4], 4294967168 }
 0x191   :  { %140 = vsyncpa [#allocation3], 1 }
 0x192   :  { %141 = vsyncpa [#allocation4], 1 }

// kernel: _composite_dense_forward_jit.1
= control target key start
LH: loop header
LB: loop body
LE: loop exit
PB: predicated region body
PF: predicated region fallthrough
CT: control target
= control target key end

     0   :  { %9 = vsyncpa [#allocation3], 0  ;;  %s286_s0 = inlined_call_operand.hbm [shape: f32[8,32], index: 0, kind: input, shape index: {}]   ;;  %s287_s1 = inlined_call_operand.vmem [shape: f32[32,48], index: 1, kind: input, shape index: {}]   ;;  %s288_s2 = inlined_call_operand.vmem [shape: f32[48,64], index: 2, kind: input, shape index: {}]   ;;  %s289_s3 = inlined_call_operand.vmem [shape: f32[64,16], index: 3, kind: input, shape index: {}]   ;;  %s290_s4 = inlined_call_operand.hbm [shape: f32[8,16], index: 4, kind: output, shape index: {}]  }
   0x1   :  { %10 = vsyncpa [#allocation4], 0  ;;  %s16_s17 = sshll.u32 %s286_s0, 4  ;;  %s199_s18 = smov [#allocation2]   ;;  %s17_s17 = int_to_ptr.hbm [resolvable:$true] %s16_s17 }
   0x2   :  { %s18_s19 = sshll.u32 %s199_s18, 4  ;;  %s19_s19 = int_to_ptr.vmem [resolvable:$true] %s18_s19 }
   0x3   :  { %21 = dma.hbm_to_vmem [thread:$0]  %s17_s17, 128, %s19_s19, [#allocation3]  }
   0x4   :  { %195 = dma.done.wait [#allocation3], 128  }
   0x5   :  { %196 = vsyncadd [#allocation3], 4294967168  ;;  %v36_v0 = vld [vmem:[%s287_s1 + $0x18] sm:$0xff]  ;;  %v35_v1 = vld [vmem:[%s287_s1 + $0x10] sm:$0xff]  ;;  %vm37_vm0 = vcmask 261120   ;;  %vm67_vm1 = vcmask 392192  }
   0x6   :  { %53 = vmatpush.msra.mxu0 %v36_v0  ;;  %v66_v2 = vld [vmem:[%s288_s2 + $0x28] sm:$0xff]  ;;  %v65_v4 = vld [vmem:[%s288_s2 + $0x20] sm:$0xff]  ;;  %v64_v5 = vld [vmem:[%s288_s2 + $0x18] sm:$0xff]  ;;  %vm99_vm2 = vcmask 523264   ;;  %s200_s26 = smov [#allocation5]   ;;  %s132_s30 = sshll.u32 %s290_s4, 4  ;;  %s133_s30 = int_to_ptr.hbm [resolvable:$true] %s132_s30 }
   0x7   :  { %v34_v3 = vld [vmem:[%s287_s1 + $0x8] sm:$0xff]  ;;  %81 = vmatpush.msra.mxu1 %v66_v2  ;;  %v33_v6 = vld [vmem:[%s287_s1] sm:$0xff]  ;;  %v63_v8 = vld [vmem:[%s288_s2 + $0x10] sm:$0xff]  ;;  %s130_s27 = sshll.u32 %s200_s26, 4  ;;  %vm123_vm3 = vcmask 130048   ;;  %s131_s27 = int_to_ptr.vmem [resolvable:$true] %s130_s27 }
   0x8   :  { %54 = vmatpush.msra.mxu0 %v35_v1  ;;  %v32_v7 = vld [vmem:[#allocation2] sm:$0xff]  ;;  %v62_v9 = vld [vmem:[%s288_s2 + $0x8] sm:$0xff]  ;;  %v98_v11 = vld [vmem:[%s289_s3 + $0x38] sm:$0xff] }
   0x9   :  { %82 = vmatpush.msra.mxu1 %v65_v4  ;;  %v61_v10 = vld [vmem:[%s288_s2] sm:$0xff]  ;;  %v97_v12 = vld [vmem:[%s289_s3 + $0x30] sm:$0xff]  ;;  %111 = vmatpush.msra.mxu2 %v98_v11  ;;  %v96_v13 = vld [vmem:[%s289_s3 + $0x28] sm:$0xff] }
   0xa   :  { %55 = vmatpush.msra.mxu0 %v34_v3  ;;  %v95_v14 = vld [vmem:[%s289_s3 + $0x20] sm:$0xff]  ;;  %v94_v15 = vld [vmem:[%s289_s3 + $0x18] sm:$0xff]  ;;  %v93_v16 = vld [vmem:[%s289_s3 + $0x10] sm:$0xff] }
   0xb   :  { %83 = vmatpush.msra.mxu1 %v64_v5  ;;  %112 = vmatpush.msra.mxu2 %v97_v12  ;;  %v92_v17 = vld [vmem:[%s289_s3 + $0x8] sm:$0xff]  ;;  %v91_v19 = vld [vmem:[%s289_s3] sm:$0xff] }
   0xc   :  { %56 = vmatpush.msra.mxu0 %v33_v6 }
   0xd   :  { %142 = vmatmul.msk.f32.vlgmr.msra.gmra.mxu0 %vm37_vm0, %v32_v7  ;;  %84 = vmatpush.msra.mxu1 %v63_v8 }
   0xe   :  { %113 = vmatpush.msra.mxu2 %v96_v13 }
   0xf   :  { %85 = vmatpush.msra.mxu1 %v62_v9 }
  0x10   :  { %114 = vmatpush.msra.mxu2 %v95_v14 }
  0x11   :  { %86 = vmatpush.msra.mxu1 %v61_v10 }
  0x12   :  { %115 = vmatpush.msra.mxu2 %v94_v15 }
  0x14   :  { %116 = vmatpush.msra.mxu2 %v93_v16 }
  0x16   :  { %117 = vmatpush.msra.mxu2 %v92_v17 }
  0x18   :  { %118 = vmatpush.msra.mxu2 %v91_v19 }
  0x8a   :  { %v58_v18 = vpop.f32.mrf.mxu0 }
  0x8b   :  { %143 = vmatmul.msk.f32.vlgmr.msra.gmra.mxu1 %vm67_vm1, %v58_v18 }
 0x108   :  { %v88_v20 = vpop.f32.mrf.mxu1 }
 0x109   :  { %144 = vmatmul.msk.f32.vlgmr.msra.gmra.mxu2 %vm99_vm2, %v88_v20 }
 0x18c   :  { %v120_v21 = vpop.f32.mrf.mxu2 }
 0x18d   :  { %124 = vst.msk [vmem:[#allocation5] sm:$0xff] %vm123_vm3, %v120_v21 }
 0x18e   :  { %135 = dma.vmem_to_hbm [thread:$0]  %s131_s27, 128, %s133_s30, [#allocation4]  }
 0x18f   :  { %197 = dma.done.wait [#allocation4], 128  }
 0x190   :  { %198 = vsyncadd [#allocation4], 4294967168 }
 0x191   :  { %140 = vsyncpa [#allocation3], 1 }
 0x192   :  { %141 = vsyncpa [#allocation4], 1 }

</bundles_post_ra>
